<compile_context>
chip_gen: v7x
topology: tpu7x:2x2x1
jax: 0.10.0
libtpu: 0.0.40
codegen_flags: <defaults>
</compile_context>

<pallas_src>
import jax
import jax.numpy as jnp
from jax.experimental import pallas as pl
from jax.experimental.pallas import tpu as pltpu

IN_DIM = 28 * 28   # 784
OUT_DIM = 10
LANE = 128
SUBLANE = 8
MAX_TB = 2048      # batch tile cap: safe for v7x 64 MiB VMEM / 32 MiB scoped default


def _round_up(n, m):
    return ((n + m - 1) // m) * m


def _linear_kernel(x_ref, w_ref, b_ref, o_ref):
    # x_ref: (TB, in_dim); w_ref: (in_dim, OUT_PAD); b_ref: (1, OUT_PAD);
    # o_ref: (TB, OUT_PAD). Single MXU matmul + bias, f32 accumulate.
    acc = jnp.dot(x_ref[...], w_ref[...], preferred_element_type=jnp.float32)
    o_ref[...] = (acc + b_ref[...]).astype(o_ref.dtype)


@jax.jit
def multi_logistic_forward(x, w, b):
    """Forward of MultiLogisticModel.

    x: (B, in_dim) f32
    w: (out_dim, in_dim) f32  (torch nn.Linear weight layout)
    b: (out_dim,) f32
    returns: (B, out_dim) f32  ==  x @ w.T + b
    """
    B, in_dim = x.shape
    out_dim = w.shape[0]

    # --- lane-dense padding of the N (output) dimension to a multiple of 128 ---
    out_pad = _round_up(out_dim, LANE)
    w_t = jnp.zeros((in_dim, out_pad), x.dtype).at[:, :out_dim].set(
        w.T.astype(x.dtype))
    b2d = jnp.zeros((1, out_pad), jnp.float32).at[:, :out_dim].set(
        b.astype(jnp.float32))

    # --- batch tiling: big tiles, padded so every block is full ---
    tb = min(MAX_TB, _round_up(B, SUBLANE))
    b_pad = _round_up(B, tb)
    if b_pad != B:
        x = jnp.pad(x, ((0, b_pad - B), (0, 0)))
    grid = (b_pad // tb,)

    # TODO(synk): for large-batch inference, optionally cast x/w_t to bf16 here
    # (keep f32 accumulate) to halve HBM traffic at ~1e-2-level numeric delta.
    out = pl.pallas_call(
        _linear_kernel,
        out_shape=jax.ShapeDtypeStruct((b_pad, out_pad), x.dtype),
        grid=grid,
        in_specs=[
            pl.BlockSpec((tb, in_dim), lambda i: (i, 0)),          # x: streamed per tile
            pl.BlockSpec((in_dim, out_pad), lambda i: (0, 0)),     # W^T: VMEM-resident
            pl.BlockSpec((1, out_pad), lambda i: (0, 0)),          # bias: VMEM-resident
        ],
        out_specs=pl.BlockSpec((tb, out_pad), lambda i: (i, 0)),
        compiler_params=pltpu.CompilerParams(
            dimension_semantics=("parallel",),
        ),
    )(x, w_t, b2d)

    return out[:B, :out_dim]


if __name__ == "__main__":
    key = jax.random.PRNGKey(0)
    k_x, k_w, k_b = jax.random.split(key, 3)

    B = 8  # small batch consistent with the module (MNIST-style rows)

    # nn.Linear-style uniform(-1/sqrt(fan_in), 1/sqrt(fan_in)) init, torch layout.
    bound = 1.0 / (IN_DIM ** 0.5)
    w = jax.random.uniform(k_w, (OUT_DIM, IN_DIM), jnp.float32, -bound, bound)
    b = jax.random.uniform(k_b, (OUT_DIM,), jnp.float32, -bound, bound)
    x = jax.random.normal(k_x, (B, IN_DIM), jnp.float32)

    out = multi_logistic_forward(x, w, b)
    out = jax.block_until_ready(out)

    # Reference check against plain JAX (same math as torch F.linear).
    ref = x @ w.T + b
    assert out.shape == (B, OUT_DIM), out.shape
    assert jnp.allclose(out, ref, atol=1e-4, rtol=1e-4), float(
        jnp.max(jnp.abs(out - ref)))

    print("KERNEL_OK")
</pallas_src>

<mosaic_0001>
module attributes {stable_mosaic.version = 11 : i64} {
  func.func @_linear_kernel(%arg0: i32, %arg1: memref<8x784xf32, #tpu.memory_space<vmem>>, %arg2: memref<784x128xf32, #tpu.memory_space<vmem>>, %arg3: memref<1x128xf32, #tpu.memory_space<vmem>>, %arg4: memref<8x128xf32, #tpu.memory_space<vmem>>) attributes {dimension_semantics = [#tpu.dimension_semantics<parallel>], iteration_bounds = array<i64: 1>, scalar_prefetch = 0 : i64, scratch_operands = 0 : i64, tpu.core_type = #tpu.core_type<tc>, window_params = [{transform_indices = @transform_0, window_bounds = array<i64: 8, 784>}, {pipeline_mode = #tpu.pipeline_mode<synchronous>, transform_indices = @transform_1, window_bounds = array<i64: 784, 128>}, {pipeline_mode = #tpu.pipeline_mode<synchronous>, transform_indices = @transform_2, window_bounds = array<i64: 1, 128>}, {transform_indices = @transform_3, window_bounds = array<i64: 8, 128>}]} {
    %c0 = arith.constant 0 : index
    %c0_0 = arith.constant 0 : index
    %0 = vector.load %arg1[%c0, %c0_0] : memref<8x784xf32, #tpu.memory_space<vmem>>, vector<8x784xf32>
    %c0_1 = arith.constant 0 : index
    %c0_2 = arith.constant 0 : index
    %1 = vector.load %arg2[%c0_1, %c0_2] : memref<784x128xf32, #tpu.memory_space<vmem>>, vector<784x128xf32>
    %cst = arith.constant dense<0.000000e+00> : vector<8x128xf32>
    %2 = tpu.matmul %0, %1, %cst {dimension_numbers = #tpu.dot_dimension_numbers<[1], [0], [0], [1], [0, 0, 1, 1], [], []>} : vector<8x784xf32>, vector<784x128xf32>, vector<8x128xf32> -> vector<8x128xf32>
    %c0_3 = arith.constant 0 : index
    %c0_4 = arith.constant 0 : index
    %3 = vector.load %arg3[%c0_3, %c0_4] : memref<1x128xf32, #tpu.memory_space<vmem>>, vector<1x128xf32>
    %4 = vector.broadcast %3 : vector<1x128xf32> to vector<8x128xf32>
    %5 = arith.addf %2, %4 : vector<8x128xf32>
    %c0_5 = arith.constant 0 : index
    %c0_6 = arith.constant 0 : index
    %6 = vector.load %arg4[%c0_5, %c0_6] : memref<8x128xf32, #tpu.memory_space<vmem>>, vector<8x128xf32>
    tpu.vector_store %arg4[%c0_5, %c0_6], %5 {strides = array<i32>} : memref<8x128xf32, #tpu.memory_space<vmem>>, vector<8x128xf32>,
    return
  }
  func.func @transform_0(%arg0: i32) -> (i32, i32) {
    %c0_i32 = arith.constant 0 : i32
    %c0_i32_0 = arith.constant 0 : i32
    return %arg0, %c0_i32 : i32, i32
  }
  func.func @transform_1(%arg0: i32) -> (i32, i32) {
    %c0_i32 = arith.constant 0 : i32
    %c0_i32_0 = arith.constant 0 : i32
    %c0_i32_1 = arith.constant 0 : i32
    return %c0_i32, %c0_i32_0 : i32, i32
  }
  func.func @transform_2(%arg0: i32) -> (i32, i32) {
    %c0_i32 = arith.constant 0 : i32
    %c0_i32_0 = arith.constant 0 : i32
    %c0_i32_1 = arith.constant 0 : i32
    return %c0_i32, %c0_i32_0 : i32, i32
  }
  func.func @transform_3(%arg0: i32) -> (i32, i32) {
    %c0_i32 = arith.constant 0 : i32
    %c0_i32_0 = arith.constant 0 : i32
    return %arg0, %c0_i32 : i32, i32
  }
}

</mosaic_0001>

<bundles_post_ra>
// kernel: multi_logistic_forward.1
= control target key start
LH: loop header
LB: loop body
LE: loop exit
PB: predicated region body
PF: predicated region fallthrough
CT: control target
= control target key end

     0   :  { %s1024_s0 = inlined_call_operand.vmem [shape: f32[8,784], index: 0, kind: input, shape index: {}]   ;;  %s1025_s1 = inlined_call_operand.vmem [shape: f32[784,128], index: 1, kind: input, shape index: {}]   ;;  %s1026_s2 = inlined_call_operand.vmem [shape: f32[1,128], index: 2, kind: input, shape index: {}]   ;;  %s1027_s3 = inlined_call_operand.hbm [shape: f32[8,128], index: 3, kind: output, shape index: {}]  }
   0x1   :  { %v38_v0 = vld [vmem:[%s1025_s1 + $0x80] sm:$0xff]  ;;  %v39_v1 = vld [vmem:[%s1025_s1 + $0x88] sm:$0xff]  ;;  %v40_v11 = vld [vmem:[%s1025_s1 + $0x90] sm:$0xff] }
   0x2   :  { %v22_v2 = vld [vmem:[%s1025_s1] sm:$0xff]  ;;  %v543_v3 = vpack.c.bf16 %v39_v1, %v38_v0  ;;  %v23_v4 = vld [vmem:[%s1025_s1 + $0x8] sm:$0xff]  ;;  %v41_v13 = vld [vmem:[%s1025_s1 + $0x98] sm:$0xff] }
   0x3   :  { %v70_v5 = vld [vmem:[%s1025_s1 + $0x180] sm:$0xff]  ;;  %v71_v6 = vld [vmem:[%s1025_s1 + $0x188] sm:$0xff]  ;;  %v545_v7 = vpack.c.bf16 %v23_v4, %v22_v2  ;;  %v24_v14 = vld [vmem:[%s1025_s1 + $0x10] sm:$0xff]  ;;  %v547_v16 = vpack.c.bf16 %v41_v13, %v40_v11 }
   0x4   :  { %v575_v8 = vpack.c.bf16 %v71_v6, %v70_v5  ;;  %v54_v9 = vld [vmem:[%s1025_s1 + $0x100] sm:$0xff]  ;;  %v55_v10 = vld [vmem:[%s1025_s1 + $0x108] sm:$0xff]  ;;  %544 = vmatprep.subr.bf16.mxu0 %v543_v3  ;;  %v25_v15 = vld [vmem:[%s1025_s1 + $0x18] sm:$0xff] }
   0x5   :  { %v577_v12 = vpack.c.bf16 %v55_v10, %v54_v9  ;;  %546 = vmatpush3.bf16.msra.mxu0 %v545_v7  ;;  %v549_v17 = vpack.c.bf16 %v25_v15, %v24_v14  ;;  %v72_v18 = vld [vmem:[%s1025_s1 + $0x190] sm:$0xff]  ;;  %v73_v19 = vld [vmem:[%s1025_s1 + $0x198] sm:$0xff]  ;;  %v42_v23 = vld [vmem:[%s1025_s1 + $0xa0] sm:$0xff] }
   0x6   :  { %576 = vmatprep.subr.bf16.mxu1 %v575_v8  ;;  %v56_v20 = vld [vmem:[%s1025_s1 + $0x110] sm:$0xff]  ;;  %v579_v21 = vpack.c.bf16 %v73_v19, %v72_v18  ;;  %v57_v22 = vld [vmem:[%s1025_s1 + $0x118] sm:$0xff]  ;;  %v43_v24 = vld [vmem:[%s1025_s1 + $0xa8] sm:$0xff]  ;;  %548 = vmatprep.subr.bf16.mxu0 %v547_v16 }
   0x7   :  { %578 = vmatpush3.bf16.msra.mxu1 %v577_v12  ;;  %v581_v25 = vpack.c.bf16 %v57_v22, %v56_v20  ;;  %v551_v26 = vpack.c.bf16 %v43_v24, %v42_v23  ;;  %v26_v27 = vld [vmem:[%s1025_s1 + $0x20] sm:$0xff]  ;;  %v27_v28 = vld [vmem:[%s1025_s1 + $0x28] sm:$0xff]  ;;  %v44_v35 = vld [vmem:[%s1025_s1 + $0xb0] sm:$0xff] }
   0x8   :  { %v74_v29 = vld [vmem:[%s1025_s1 + $0x1a0] sm:$0xff]  ;;  %580 = vmatprep.subr.bf16.mxu1 %v579_v21  ;;  %v75_v30 = vld [vmem:[%s1025_s1 + $0x1a8] sm:$0xff]  ;;  %v553_v33 = vpack.c.bf16 %v27_v28, %v26_v27  ;;  %v45_v36 = vld [vmem:[%s1025_s1 + $0xb8] sm:$0xff] }
   0x9   :  { %v58_v31 = vld [vmem:[%s1025_s1 + $0x120] sm:$0xff]  ;;  %v59_v32 = vld [vmem:[%s1025_s1 + $0x128] sm:$0xff]  ;;  %550 = vmatpush3.bf16.msra.mxu0 %v549_v17  ;;  %v583_v34 = vpack.c.bf16 %v75_v30, %v74_v29  ;;  %v28_v37 = vld [vmem:[%s1025_s1 + $0x30] sm:$0xff]  ;;  %v555_v39 = vpack.c.bf16 %v45_v36, %v44_v35 }
   0xa   :  { %552 = vmatprep.subr.bf16.mxu0 %v551_v26  ;;  %v585_v38 = vpack.c.bf16 %v59_v32, %v58_v31  ;;  %v29_v40 = vld [vmem:[%s1025_s1 + $0x38] sm:$0xff]  ;;  %v76_v41 = vld [vmem:[%s1025_s1 + $0x1b0] sm:$0xff]  ;;  %v46_v46 = vld [vmem:[%s1025_s1 + $0xc0] sm:$0xff] }
   0xb   :  { %582 = vmatpush3.bf16.msra.mxu1 %v581_v25  ;;  %v77_v42 = vld [vmem:[%s1025_s1 + $0x1b8] sm:$0xff]  ;;  %v60_v44 = vld [vmem:[%s1025_s1 + $0x130] sm:$0xff]  ;;  %v47_v47 = vld [vmem:[%s1025_s1 + $0xc8] sm:$0xff]  ;;  %v557_v48 = vpack.c.bf16 %v29_v40, %v28_v37 }
   0xc   :  { %584 = vmatprep.subr.bf16.mxu1 %v583_v34  ;;  %v587_v43 = vpack.c.bf16 %v77_v42, %v76_v41  ;;  %v61_v45 = vld [vmem:[%s1025_s1 + $0x138] sm:$0xff]  ;;  %v78_v49 = vld [vmem:[%s1025_s1 + $0x1c0] sm:$0xff]  ;;  %v79_v50 = vld [vmem:[%s1025_s1 + $0x1c8] sm:$0xff]  ;;  %v559_v52 = vpack.c.bf16 %v47_v47, %v46_v46 }
   0xd   :  { %554 = vmatpush3.bf16.msra.mxu0 %v553_v33  ;;  %v589_v51 = vpack.c.bf16 %v61_v45, %v60_v44  ;;  %v30_v53 = vld [vmem:[%s1025_s1 + $0x40] sm:$0xff]  ;;  %v31_v54 = vld [vmem:[%s1025_s1 + $0x48] sm:$0xff]  ;;  %v591_v56 = vpack.c.bf16 %v79_v50, %v78_v49  ;;  %v48_v58 = vld [vmem:[%s1025_s1 + $0xd0] sm:$0xff]  ;;  %v670_v50 = vmov 0.0|0.0  }
   0xe   :  { %556 = vmatprep.subr.bf16.mxu0 %v555_v39  ;;  %v62_v55 = vld [vmem:[%s1025_s1 + $0x140] sm:$0xff]  ;;  %v63_v57 = vld [vmem:[%s1025_s1 + $0x148] sm:$0xff]  ;;  %v49_v59 = vld [vmem:[%s1025_s1 + $0xd8] sm:$0xff]  ;;  %v561_v62 = vpack.c.bf16 %v31_v54, %v30_v53 }
   0xf   :  { %586 = vmatpush3.bf16.msra.mxu1 %v585_v38  ;;  %v80_v60 = vld [vmem:[%s1025_s1 + $0x1d0] sm:$0xff]  ;;  %v81_v61 = vld [vmem:[%s1025_s1 + $0x1d8] sm:$0xff]  ;;  %v593_v63 = vpack.c.bf16 %v63_v57, %v62_v55  ;;  %v563_v0 = vpack.c.bf16 %v49_v59, %v48_v58  ;;  %v50_v6 = vld [vmem:[%s1025_s1 + $0xe0] sm:$0xff] }
  0x10   :  { %588 = vmatprep.subr.bf16.mxu1 %v587_v43  ;;  %v32_v1 = vld [vmem:[%s1025_s1 + $0x50] sm:$0xff]  ;;  %v33_v2 = vld [vmem:[%s1025_s1 + $0x58] sm:$0xff]  ;;  %v595_v4 = vpack.c.bf16 %v81_v61, %v80_v60  ;;  %v51_v7 = vld [vmem:[%s1025_s1 + $0xe8] sm:$0xff] }
  0x11   :  { %558 = vmatpush3.bf16.msra.mxu0 %v557_v48  ;;  %v64_v3 = vld [vmem:[%s1025_s1 + $0x150] sm:$0xff]  ;;  %v65_v5 = vld [vmem:[%s1025_s1 + $0x158] sm:$0xff]  ;;  %v82_v8 = vld [vmem:[%s1025_s1 + $0x1e0] sm:$0xff]  ;;  %v565_v10 = vpack.c.bf16 %v33_v2, %v32_v1  ;;  %v567_v14 = vpack.c.bf16 %v51_v7, %v50_v6 }
  0x12   :  { %560 = vmatprep.subr.bf16.mxu0 %v559_v52  ;;  %v83_v9 = vld [vmem:[%s1025_s1 + $0x1e8] sm:$0xff]  ;;  %v34_v11 = vld [vmem:[%s1025_s1 + $0x60] sm:$0xff]  ;;  %v597_v13 = vpack.c.bf16 %v65_v5, %v64_v3  ;;  %v52_v19 = vld [vmem:[%s1025_s1 + $0xf0] sm:$0xff] }
  0x13   :  { %590 = vmatpush3.bf16.msra.mxu1 %v589_v51  ;;  %v16_v12 = vld [vmem:[%s1024_s0 + $0x8] sm:$0xff]  ;;  %v66_v16 = vld [vmem:[%s1025_s1 + $0x160] sm:$0xff]  ;;  %v599_v18 = vpack.c.bf16 %v83_v9, %v82_v8  ;;  %v53_v20 = vld [vmem:[%s1025_s1 + $0xf8] sm:$0xff] }
  0x14   :  { %592 = vmatprep.subr.bf16.mxu1 %v591_v56  ;;  %v35_v15 = vld [vmem:[%s1025_s1 + $0x68] sm:$0xff]  ;;  %195 = vmatprep.mubr.f32.mxu0 %v16_v12  ;;  %v18_v21 = vld [vmem:[%s1024_s0 + $0x18] sm:$0xff]  ;;  %v84_v22 = vld [vmem:[%s1025_s1 + $0x1f0] sm:$0xff]  ;;  %v571_v26 = vpack.c.bf16 %v53_v20, %v52_v19 }
  0x15   :  { %562 = vmatpush3.bf16.msra.mxu0 %v561_v62  ;;  %v67_v17 = vld [vmem:[%s1025_s1 + $0x168] sm:$0xff]  ;;  %v85_v23 = vld [vmem:[%s1025_s1 + $0x1f8] sm:$0xff]  ;;  %265 = vmatprep.mubr.f32.mxu1 %v18_v21  ;;  %v569_v24 = vpack.c.bf16 %v35_v15, %v34_v11  ;;  %v36_v27 = vld [vmem:[%s1025_s1 + $0x70] sm:$0xff] }
  0x16   :  { %564 = vmatprep.subr.bf16.mxu0 %v563_v0  ;;  %v601_v25 = vpack.c.bf16 %v67_v17, %v66_v16  ;;  %v37_v28 = vld [vmem:[%s1025_s1 + $0x78] sm:$0xff]  ;;  %v68_v29 = vld [vmem:[%s1025_s1 + $0x170] sm:$0xff]  ;;  %v603_v30 = vpack.c.bf16 %v85_v23, %v84_v22  ;;  %v102_v32 = vld [vmem:[%s1025_s1 + $0x280] sm:$0xff] }
  0x17   :  { %594 = vmatpush3.bf16.msra.mxu1 %v593_v63  ;;  %v69_v31 = vld [vmem:[%s1025_s1 + $0x178] sm:$0xff]  ;;  %v103_v33 = vld [vmem:[%s1025_s1 + $0x288] sm:$0xff]  ;;  %v573_v34 = vpack.c.bf16 %v37_v28, %v36_v27  ;;  %v86_v37 = vld [vmem:[%s1025_s1 + $0x200] sm:$0xff] }
  0x18   :  { %596 = vmatprep.subr.bf16.mxu1 %v595_v4  ;;  %v605_v35 = vpack.c.bf16 %v69_v31, %v68_v29  ;;  %v607_v36 = vpack.c.bf16 %v103_v33, %v102_v32  ;;  %v87_v38 = vld [vmem:[%s1025_s1 + $0x208] sm:$0xff]  ;;  %v104_v39 = vld [vmem:[%s1025_s1 + $0x290] sm:$0xff]  ;;  %v105_v40 = vld [vmem:[%s1025_s1 + $0x298] sm:$0xff] }
  0x19   :  { %566 = vmatpush3.bf16.msra.mxu0 %v565_v10  ;;  %v15_v41 = vld [vmem:[%s1024_s0] sm:$0xff]  ;;  %v609_v42 = vpack.c.bf16 %v87_v38, %v86_v37  ;;  %v17_v43 = vld [vmem:[%s1024_s0 + $0x10] sm:$0xff]  ;;  %v611_v45 = vpack.c.bf16 %v105_v40, %v104_v39  ;;  %v89_v46 = vld [vmem:[%s1025_s1 + $0x218] sm:$0xff] }
  0x1a   :  { %568 = vmatprep.subr.bf16.mxu0 %v567_v14  ;;  %v88_v44 = vld [vmem:[%s1025_s1 + $0x210] sm:$0xff]  ;;  %v106_v47 = vld [vmem:[%s1025_s1 + $0x2a0] sm:$0xff]  ;;  %v107_v48 = vld [vmem:[%s1025_s1 + $0x2a8] sm:$0xff] }
  0x1b   :  { %598 = vmatpush3.bf16.msra.mxu1 %v597_v13  ;;  %v20_v49 = vld [vmem:[%s1024_s0 + $0x28] sm:$0xff]  ;;  %v118_v51 = vld [vmem:[%s1025_s1 + $0x300] sm:$0xff] }
  0x1c   :  { %600 = vmatprep.subr.bf16.mxu1 %v599_v18  ;;  %v119_v52 = vld [vmem:[%s1025_s1 + $0x308] sm:$0xff] }
  0x1d   :  { %570 = vmatpush3.bf16.msra.mxu0 %v569_v24  ;;  %v640_v53 = vpack.c.bf16 %v119_v52, %v118_v51 }
  0x1e   :  { %572 = vmatprep.subr.bf16.mxu0 %v571_v26 }
  0x1f   :  { %602 = vmatpush3.bf16.msra.mxu1 %v601_v25 }
  0x20   :  { %604 = vmatprep.subr.bf16.mxu1 %v603_v30 }
  0x21   :  { %574 = vmatpush3.bf16.msra.mxu0 %v573_v34 }
  0x22   :  { %608 = vmatprep.subr.bf16.mxu0 %v607_v36 }
  0x23   :  { %606 = vmatpush3.bf16.msra.mxu1 %v605_v35 }
  0x24   :  { %639 = vmatprep.subr.bf16.mxu1 %v670_v50  ;;  %196 = vmatmul.mubr.f32.vlgmr.msra.gmra.mrb[0].mxu0 %v15_v41 }
  0x25   :  { %8 = vsyncpa [#allocation3], 0  ;;  %610 = vmatpush3.bf16.msra.mxu0 %v609_v42  ;;  %v613_v54 = vpack.c.bf16 %v89_v46, %v88_v44  ;;  %v615_v55 = vpack.c.bf16 %v107_v48, %v106_v47  ;;  %v90_v56 = vld [vmem:[%s1025_s1 + $0x220] sm:$0xff]  ;;  %v91_v57 = vld [vmem:[%s1025_s1 + $0x228] sm:$0xff]  ;;  %335 = vmatprep.mubr.f32.mxu0 %v20_v49  ;;  %vm671_vm0 = vmmov 0   ;;  %v672_v60 = vmov 0.0  }
  0x26   :  { %266 = vmatmul.mubr.f32.vlgmr.msra.gmra.mrb[0].mxu1 %v17_v43  ;;  %612 = vmatprep.subr.bf16.mxu0 %v611_v45  ;;  %v108_v58 = vld [vmem:[%s1025_s1 + $0x2b0] sm:$0xff]  ;;  %v109_v59 = vld [vmem:[%s1025_s1 + $0x2b8] sm:$0xff]  ;;  %vm127_vm1 = vcmask 130048   ;;  %v617_v62 = vpack.c.bf16 %v91_v57, %v90_v56  ;;  %v110_v2 = vld [vmem:[%s1025_s1 + $0x2c0] sm:$0xff] }
  0x27   :  { %641 = vmatpush3.bf16.msra.mxu1 %v640_v53  ;;  %540 = vmatprep.mubr.msk.f32.mxu1 %vm671_vm0, %v672_v60  ;;  %v21_v61 = vld [vmem:[%s1024_s0 + $0x30] sm:$0xff]  ;;  %v619_v63 = vpack.c.bf16 %v109_v59, %v108_v58  ;;  %v93_v1 = vld [vmem:[%s1025_s1 + $0x238] sm:$0xff]  ;;  %v111_v3 = vld [vmem:[%s1025_s1 + $0x2c8] sm:$0xff] }
  0x28   :  { %v92_v0 = vld [vmem:[%s1025_s1 + $0x230] sm:$0xff]  ;;  %v623_v5 = vpack.c.bf16 %v111_v3, %v110_v2  ;;  %v94_v6 = vld [vmem:[%s1025_s1 + $0x240] sm:$0xff]  ;;  %v95_v7 = vld [vmem:[%s1025_s1 + $0x248] sm:$0xff] }
  0x29   :  { %614 = vmatpush3.bf16.msra.mxu0 %v613_v54  ;;  %v621_v4 = vpack.c.bf16 %v93_v1, %v92_v0  ;;  %v112_v8 = vld [vmem:[%s1025_s1 + $0x2d0] sm:$0xff]  ;;  %v113_v9 = vld [vmem:[%s1025_s1 + $0x2d8] sm:$0xff]  ;;  %v625_v10 = vpack.c.bf16 %v95_v7, %v94_v6  ;;  %v114_v14 = vld [vmem:[%s1025_s1 + $0x2e0] sm:$0xff] }
  0x2a   :  { %616 = vmatprep.subr.bf16.mxu0 %v615_v55  ;;  %541 = vmatmul.mubr.msk.f32.vlgmr.msra.gmra.mrb[2].mxu1 %vm127_vm1, %v21_v61  ;;  %v627_v11 = vpack.c.bf16 %v113_v9, %v112_v8  ;;  %v96_v12 = vld [vmem:[%s1025_s1 + $0x250] sm:$0xff]  ;;  %v97_v13 = vld [vmem:[%s1025_s1 + $0x258] sm:$0xff]  ;;  %v115_v15 = vld [vmem:[%s1025_s1 + $0x2e8] sm:$0xff] }
  0x2b   :  { %v629_v16 = vpack.c.bf16 %v97_v13, %v96_v12  ;;  %v631_v17 = vpack.c.bf16 %v115_v15, %v114_v14  ;;  %v98_v18 = vld [vmem:[%s1025_s1 + $0x260] sm:$0xff]  ;;  %v99_v19 = vld [vmem:[%s1025_s1 + $0x268] sm:$0xff]  ;;  %v116_v20 = vld [vmem:[%s1025_s1 + $0x2f0] sm:$0xff] }
  0x2c   :  { %v117_v21 = vld [vmem:[%s1025_s1 + $0x2f8] sm:$0xff]  ;;  %v633_v22 = vpack.c.bf16 %v99_v19, %v98_v18  ;;  %v100_v24 = vld [vmem:[%s1025_s1 + $0x270] sm:$0xff]  ;;  %v19_v27 = vld [vmem:[%s1024_s0 + $0x20] sm:$0xff] }
  0x2d   :  { %618 = vmatpush3.bf16.msra.mxu0 %v617_v62  ;;  %v635_v23 = vpack.c.bf16 %v117_v21, %v116_v20  ;;  %v101_v25 = vld [vmem:[%s1025_s1 + $0x278] sm:$0xff]  ;;  %v426_v29 = vld [vmem:[%s1026_s2] ss:$0 sm:$0xff]  ;;  %s673_s1 = smov [#allocation2]  }
  0x2e   :  { %620 = vmatprep.subr.bf16.mxu0 %v619_v63  ;;  %v637_v26 = vpack.c.bf16 %v101_v25, %v100_v24  ;;  %s418_s0 = sshll.u32 %s673_s1, 4  ;;  %s419_s0 = int_to_ptr.vmem [resolvable:$true] %s418_s0 }
  0x2f   :  { %s646_s8 = scalar_lea.vmem %s419_s0, 128  ;;  %p651_p1 = scmp.lt.s32.totalorder %s419_s0, %s419_s0 }
  0x30   :  { %p647_p0 = scmp.ne.s32.totalorder %s419_s0, %s646_s8  ;;  %p652_p2 = scmp.lt.s32.totalorder %s646_s8, %s646_s8 }
  0x31   :  { %622 = vmatpush3.bf16.msra.mxu0 %v621_v4 }
  0x32   :  { %624 = vmatprep.subr.bf16.mxu0 %v623_v5  ;;  %p653_p3 = por %p652_p2, %p651_p1 }
  0x34   :  { %p654_p4 = pnand %p653_p3, %p647_p0 }
  0x35   :  { %626 = vmatpush3.bf16.msra.mxu0 %v625_v10 }
  0x36   :  { %628 = vmatprep.subr.bf16.mxu0 %v627_v11 }
  0x39   :  { %630 = vmatpush3.bf16.msra.mxu0 %v629_v16 }
  0x3a   :  { %632 = vmatprep.subr.bf16.mxu0 %v631_v17 }
  0x3d   :  { %634 = vmatpush3.bf16.msra.mxu0 %v633_v22 }
  0x3e   :  { %636 = vmatprep.subr.bf16.mxu0 %v635_v23 }
  0x41   :  { %638 = vmatpush3.bf16.msra.mxu0 %v637_v26 }
  0x44   :  { %336 = vmatmul.mubr.f32.vlgmr.msra.gmra.mrb[2].mxu0 %v19_v27 }
  0xf7   :  { %v460_v28 = vpop.f32.mrb[0].mxu0 }
  0xf8   :  { %v461_v30 = vpop.f32.mrb[1].mxu0 }
  0xf9   :  { %v495_v31 = vpop.f32.mrb[0].mxu1  ;;  %v462_v32 = vadd.f32 %v461_v30, %v460_v28 }
  0xfa   :  { %v496_v33 = vpop.f32.mrb[1].mxu1 }
  0xfb   :  { %v497_v34 = vadd.f32 %v496_v33, %v495_v31  ;;  %v198_v35 = vadd.f32 %v462_v32, %v426_v29 }
  0xfd   :  { %v268_v36 = vadd.f32 %v497_v34, %v198_v35  ;;  %v407_v37 = vpop.f32.mrb[2].mxu1 }
  0xfe   :  { %v542_v38 = vpop.f32.mrb[3].mxu1 }
 0x117   :  { %v530_v39 = vpop.f32.mrb[2].mxu0 }
 0x118   :  { %v531_v40 = vpop.f32.mrb[3].mxu0 }
 0x119   :  { %v532_v41 = vadd.f32 %v531_v40, %v530_v39 }
 0x11b   :  { %v338_v42 = vadd.f32 %v532_v41, %v268_v36 }
 0x11d   :  { %v408_v43 = vadd.f32 %v407_v37, %v338_v42 }
 0x11f   :  { %411 = vst [vmem:[#allocation2] sm:$0xff] %v408_v43 }
 0x120   :  { %657 = shalt.err (!%p654_p4)
}
 0x121   :  { %s658_s10 = scalar_lea.hbm %s1027_s3, 128 }
 0x122   :  { %p659_p5 = scmp.ne.s32.totalorder %s1027_s3, %s658_s10  ;;  %p662_p6 = scmp.lt.u32.totalorder %s658_s10, %s1027_s3 }
 0x124   :  { %p664_p7 = pnand %p662_p6, %p659_p5 }
 0x126   :  { %667 = shalt.err (!%p664_p7)
}
 0x127   :  { %421 = dma.vmem_to_hbm [thread:$0]  %s419_s0, 128, %s1027_s3, [#allocation3]  }
 0x128   :  { %668 = dma.done.wait [#allocation3], 128  }
 0x129   :  { %669 = vsyncadd [#allocation3], 4294967168 }
 0x12a   :  { %425 = vsyncpa [#allocation3], 1 }

</bundles_post_ra>
